<compile_context>
chip_gen: v6e
topology: v6e:2x2x1
jax: 0.10.0
libtpu: 0.0.40
codegen_flags: <defaults>
</compile_context>

<pallas_src>
import functools
import math

import jax
import jax.numpy as jnp
from jax import lax
from jax.experimental import pallas as pl
from jax.experimental.pallas import tpu as pltpu

# Loud flag (review request): the reference computes an ALiBi bias tensor but
# never adds it to the scores. This kernel reproduces that behaviour exactly.
# If the reference is ever "fixed" to apply the bias, this kernel must change.
_REFERENCE_APPLIES_ALIBI_BIAS = False


# ----------------------------------------------------------------------------
# Kernel 1: fused Q/K/V projection, head-major output, Q pre-scaled.
# grid = (B, S/ts, H); H innermost so the x tiles' block index is unchanged
# across heads (Pallas skips the redundant DMA).
# ----------------------------------------------------------------------------
def _qkv_proj_kernel(xq_ref, xk_ref, xv_ref,
                     wq_ref, bq_ref, wk_ref, wv_ref, bv_ref,
                     q_out, k_out, v_out,
                     *, scale: float, weights_resident: bool):
    h = pl.program_id(2)
    wi = h if weights_resident else 0   # resident: index the full slab by head

    x_q = xq_ref[0]                     # [ts, D]
    x_k = xk_ref[0]
    x_v = xv_ref[0]

    q = jnp.dot(x_q, wq_ref[wi], preferred_element_type=jnp.float32) + bq_ref[wi]
    # K bias omitted on purpose: it adds the same vector to every key, shifting
    # each score row by a constant q_i . b_k, which cancels exactly in softmax.
    k = jnp.dot(x_k, wk_ref[wi], preferred_element_type=jnp.float32)
    v = jnp.dot(x_v, wv_ref[wi], preferred_element_type=jnp.float32) + bv_ref[wi]

    q_out[0, 0] = (q * scale).astype(q_out.dtype)   # fold 1/sqrt(d_k) into Q
    k_out[0, 0] = k.astype(k_out.dtype)
    v_out[0, 0] = v.astype(v_out.dtype)


# ----------------------------------------------------------------------------
# Kernel 2: flash-style attention over projected heads + fused output proj.
# grid = (B, S/tq, H, S/tk); (B, q-tiles) parallel, (H, kv) arbitrary reduction.
# ----------------------------------------------------------------------------
def _flash_attn_kernel(q_ref, k_ref, v_ref, wo_ref, bo_ref, o_ref,
                       m_sc, l_sc, acc_sc, out_sc,
                       *, compute_dtype, wo_resident: bool):
    h = pl.program_id(2)
    kv = pl.program_id(3)
    n_h = pl.num_programs(2)
    n_kv = pl.num_programs(3)
    wi = h if wo_resident else 0

    # Fresh output accumulator for each (batch, q-tile).
    @pl.when(jnp.logical_and(h == 0, kv == 0))
    def _():
        out_sc[...] = jnp.zeros_like(out_sc)

    # Per-head init of the online-softmax state.
    @pl.when(kv == 0)
    def _():
        m_sc[...] = jnp.full_like(m_sc, -jnp.inf)
        l_sc[...] = jnp.zeros_like(l_sc)
        acc_sc[...] = jnp.zeros_like(acc_sc)

    q = q_ref[0, 0]                     # [tq, d_k], already scaled by 1/sqrt(d_k)
    k = k_ref[0, 0]                     # [tk, d_k]
    v = v_ref[0, 0]                     # [tk, d_k]

    # scores = Q K^T (contract over d_k, no data transpose).
    # ALiBi bias intentionally omitted (computed-but-unused in the reference).
    s = lax.dot_general(q, k, (((1,), (1,)), ((), ())),
                        preferred_element_type=jnp.float32)              # [tq, tk]

    # Online (flash-style) softmax accumulation, all in f32.
    m_prev = m_sc[...]
    m_new = jnp.maximum(m_prev, jnp.max(s, axis=-1, keepdims=True))
    alpha = jnp.exp(m_prev - m_new)
    p = jnp.exp(s - m_new)
    l_sc[...] = alpha * l_sc[...] + jnp.sum(p, axis=-1, keepdims=True)
    acc_sc[...] = alpha * acc_sc[...] + jnp.dot(
        p.astype(compute_dtype), v, preferred_element_type=jnp.float32)
    m_sc[...] = m_new

    # End of this head: normalize (EUP reciprocal) and fuse this head's slice of
    # the output projection into the [tq, D] accumulator (replaces the concat).
    @pl.when(kv == n_kv - 1)
    def _():
        inv_l = pl.reciprocal(l_sc[...], approx=True)
        ctx = (acc_sc[...] * inv_l).astype(compute_dtype)                # [tq, d_k]
        out_sc[...] += jnp.dot(ctx, wo_ref[wi],
                               preferred_element_type=jnp.float32)       # [tq, D]

    # Last head & last kv tile: add output bias, store the output tile once.
    @pl.when(jnp.logical_and(h == n_h - 1, kv == n_kv - 1))
    def _():
        o_ref[0] = (out_sc[...] + bo_ref[...]).astype(o_ref.dtype)


# ----------------------------------------------------------------------------
# Wrapper
# ----------------------------------------------------------------------------
def _pick_seq_tile(S: int, preferred: int) -> int:
    """Largest multiple-of-8 tile <= preferred that divides S (or S itself)."""
    if S <= preferred:
        return S
    for t in range(preferred, 7, -8):
        if S % t == 0:
            return t
    return S


def _tpu_vmem_capacity_bytes() -> int:
    """Physical VMEM per TensorCore (128 MiB v5e/v6e, 64 MiB v7x); safe fallback."""
    try:
        info = pltpu.get_tpu_info()
        for name in ("vmem_capacity_bytes", "vmem_size_bytes", "vmem_bytes"):
            v = getattr(info, name, None)
            if v:
                return int(v)
    except Exception:
        pass
    return 128 * 2**20


def alibi_mha_forward(query, key, value, params, *, n_heads: int,
                      tq: int | None = None, tk: int | None = None,
                      ts: int | None = None,
                      compute_dtype=jnp.bfloat16):
    """query/key/value: [B, S, D]. params: PyTorch-layout weights ([D_out, D_in]) + [1, D] biases."""
    assert not _REFERENCE_APPLIES_ALIBI_BIAS, (
        "reference changed: ALiBi bias must now be added inside the kernel")
    B, S, D = query.shape
    assert D % n_heads == 0, "incompatible d_model / n_heads"
    d_k = D // n_heads
    itemsize = jnp.dtype(compute_dtype).itemsize
    out_itemsize = jnp.dtype(query.dtype).itemsize

    # ---- generation-aware budgets & tile sizes -----------------------------
    vmem_cap = _tpu_vmem_capacity_bytes()
    vmem_budget = min(int(vmem_cap * 3 // 4), 100 * 2**20)   # ~48 MiB on v7x, ~96-100 MiB on v5e/v6e
    preferred = 512 if vmem_cap >= 100 * 2**20 else 256

    tq = _pick_seq_tile(S, preferred) if tq is None else tq
    tk = _pick_seq_tile(S, preferred) if tk is None else tk
    ts = _pick_seq_tile(S, preferred) if ts is None else ts
    assert S % tq == 0 and S % tk == 0 and S % ts == 0

    # Megacore (v7x has 2 TensorCores): keep >= 2 blocks on the parallel axes.
    if B * (S // tq) < 2:
        smaller = _pick_seq_tile(S, max(8, tq // 2))
        if smaller < tq and S % smaller == 0:
            tq = smaller

    # ---- one-time wrapper-side weight re-layout (no in-kernel transposes) ---
    # PyTorch Linear: y = x @ W.T + b. Pre-transpose to [D_in, D_out] and split
    # head-major so the kernels never slice activations along lanes.
    def head_layout(w):
        w_t = jnp.transpose(w)                                          # [D_in, D_out]
        return jnp.transpose(w_t.reshape(D, n_heads, d_k), (1, 0, 2))   # [H, D, d_k]

    wq_h = head_layout(params["wq"]).astype(compute_dtype)
    wk_h = head_layout(params["wk"]).astype(compute_dtype)   # K bias dropped (cancels in softmax)
    wv_h = head_layout(params["wv"]).astype(compute_dtype)
    bq_h = params["bq"].reshape(n_heads, 1, d_k).astype(jnp.float32)
    bv_h = params["bv"].reshape(n_heads, 1, d_k).astype(jnp.float32)
    wo_h = jnp.transpose(params["wo"]).reshape(n_heads, d_k, D).astype(compute_dtype)  # [H, d_k, D]
    bo = params["bo"].astype(jnp.float32)                               # [1, D]

    xq = query.astype(compute_dtype)
    xk = key.astype(compute_dtype)
    xv = value.astype(compute_dtype)

    dkp = max(d_k, 128)   # lane padding of d_k-wide VMEM buffers

    # ---- kernel 1: Q/K/V projection -----------------------------------------
    n_s = S // ts
    proj_w_bytes = 3 * D * D * itemsize + 2 * n_heads * dkp * 4
    proj_resident = proj_w_bytes <= vmem_budget // 4

    x_spec = pl.BlockSpec((1, ts, D), lambda b, si, h: (b, si, 0))
    if proj_resident:
        w_spec = pl.BlockSpec((n_heads, D, d_k), lambda b, si, h: (0, 0, 0))
        b_spec = pl.BlockSpec((n_heads, 1, d_k), lambda b, si, h: (0, 0, 0))
    else:
        w_spec = pl.BlockSpec((1, D, d_k), lambda b, si, h: (h, 0, 0))
        b_spec = pl.BlockSpec((1, 1, d_k), lambda b, si, h: (h, 0, 0))
    p_out_spec = pl.BlockSpec((1, 1, ts, d_k), lambda b, si, h: (b, h, si, 0))
    proj_shape = jax.ShapeDtypeStruct((B, n_heads, S, d_k), compute_dtype)

    proj_vmem = (2 * 3 * ts * D * itemsize                               # x tiles (dbl-buffered)
                 + (proj_w_bytes if proj_resident
                    else 2 * (3 * D * d_k * itemsize + 2 * dkp * 4))     # weights / biases
                 + 2 * 3 * ts * dkp * itemsize)                          # output tiles
    # TODO(synk): no padding path for awkward S; guard against a tile=S VMEM blow-up.
    assert proj_vmem <= vmem_budget, (
        f"projection tiles (ts={ts}, D={D}) need ~{proj_vmem}B VMEM > budget {vmem_budget}B; "
        "pass a smaller ts or pad S")
    proj_vmem_limit = int(min(vmem_budget, max(16 * 2**20, 2 * proj_vmem)))

    proj_cost = pl.CostEstimate(
        flops=6 * B * S * D * D,
        transcendentals=0,
        bytes_accessed=int(3 * B * S * D * (itemsize + itemsize)
                           + (1 if proj_resident else B * n_s) * 3 * D * D * itemsize))

    q_p, k_p, v_p = pl.pallas_call(
        functools.partial(_qkv_proj_kernel,
                          scale=1.0 / math.sqrt(d_k),
                          weights_resident=proj_resident),
        out_shape=(proj_shape, proj_shape, proj_shape),
        grid_spec=pltpu.PrefetchScalarGridSpec(
            num_scalar_prefetch=0,
            grid=(B, n_s, n_heads),
            in_specs=[x_spec, x_spec, x_spec,
                      w_spec, b_spec, w_spec, w_spec, b_spec],
            out_specs=(p_out_spec, p_out_spec, p_out_spec)),
        compiler_params=pltpu.CompilerParams(
            dimension_semantics=("parallel", "parallel", "arbitrary"),
            vmem_limit_bytes=proj_vmem_limit),
        cost_estimate=proj_cost,
    )(xq, xk, xv, wq_h, bq_h, wk_h, wv_h, bv_h)

    # ---- kernel 2: flash attention + fused output projection ----------------
    n_q, n_kv = S // tq, S // tk
    wo_resident = (D * D * itemsize) <= vmem_budget // 8

    q_spec = pl.BlockSpec((1, 1, tq, d_k), lambda b, qi, h, kv: (b, h, qi, 0))
    kv_spec = pl.BlockSpec((1, 1, tk, d_k), lambda b, qi, h, kv: (b, h, kv, 0))
    if wo_resident:
        wo_spec = pl.BlockSpec((n_heads, d_k, D), lambda b, qi, h, kv: (0, 0, 0))
    else:
        wo_spec = pl.BlockSpec((1, d_k, D), lambda b, qi, h, kv: (h, 0, 0))
    bo_spec = pl.BlockSpec((1, D), lambda b, qi, h, kv: (0, 0))
    out_spec = pl.BlockSpec((1, tq, D), lambda b, qi, h, kv: (b, qi, 0))

    attn_vmem = (2 * (tq + 2 * tk) * dkp * itemsize                      # q/k/v tiles (dbl-buffered)
                 + (D * D * itemsize if wo_resident else 2 * d_k * D * itemsize)
                 + 2 * D * 4                                             # bo
                 + 2 * tq * D * out_itemsize                             # output tile
                 + 2 * tq * 128 * 4 + tq * dkp * 4 + tq * D * 4)         # scratch (m, l, acc, out)
    assert attn_vmem <= vmem_budget, (
        f"attention tiles (tq={tq}, tk={tk}, D={D}) need ~{attn_vmem}B VMEM > budget "
        f"{vmem_budget}B; pass smaller tq/tk or pad S")
    attn_vmem_limit = int(min(vmem_budget, max(16 * 2**20, 2 * attn_vmem)))

    attn_cost = pl.CostEstimate(
        flops=4 * B * n_heads * S * S * d_k + 2 * B * S * D * D,
        transcendentals=B * n_heads * S * S,
        bytes_accessed=int((1 + 2 * n_q) * B * S * D * itemsize          # Q once, K/V per q-tile
                           + (1 if wo_resident else B * n_q * n_heads) * d_k * D * itemsize
                           + B * S * D * out_itemsize))

    return pl.pallas_call(
        functools.partial(_flash_attn_kernel,
                          compute_dtype=compute_dtype,
                          wo_resident=wo_resident),
        out_shape=jax.ShapeDtypeStruct((B, S, D), query.dtype),
        grid_spec=pltpu.PrefetchScalarGridSpec(
            num_scalar_prefetch=0,
            grid=(B, n_q, n_heads, n_kv),
            in_specs=[q_spec, kv_spec, kv_spec, wo_spec, bo_spec],
            out_specs=out_spec,
            scratch_shapes=[
                pltpu.VMEM((tq, 1), jnp.float32),     # running row max
                pltpu.VMEM((tq, 1), jnp.float32),     # running softmax denominator
                pltpu.VMEM((tq, d_k), jnp.float32),   # P @ V accumulator
                pltpu.VMEM((tq, D), jnp.float32),     # fused output-projection accumulator
            ]),
        compiler_params=pltpu.CompilerParams(
            dimension_semantics=("parallel", "parallel", "arbitrary", "arbitrary"),
            vmem_limit_bytes=attn_vmem_limit),
        cost_estimate=attn_cost,
    )(q_p, k_p, v_p, wo_h, bo)


# ----------------------------------------------------------------------------
# Pure-JAX reference matching the PyTorch module (eval mode, no mask).
# ----------------------------------------------------------------------------
def _reference_forward(query, key, value, params, *, n_heads: int):
    B, S, D = query.shape
    d_k = D // n_heads

    def lin(x, w, b):
        return x @ w.T + b[0]

    def split_heads(x):  # [B, S, D] -> [B, H, S, d_k]
        return x.reshape(B, S, n_heads, d_k).transpose(0, 2, 1, 3)

    q = split_heads(lin(query, params["wq"], params["bq"]))
    k = split_heads(lin(key, params["wk"], params["bk"]))
    v = split_heads(lin(value, params["wv"], params["bv"]))

    scores = jnp.einsum("bhqd,bhkd->bhqk", q, k) / math.sqrt(d_k)
    p = jax.nn.softmax(scores, axis=-1)
    ctx = jnp.einsum("bhqk,bhkd->bhqd", p, v)
    ctx = ctx.transpose(0, 2, 1, 3).reshape(B, S, D)
    return lin(ctx, params["wo"], params["bo"])


def _init_linear(key, d_out, d_in):
    # PyTorch nn.Linear default init: U(-1/sqrt(fan_in), 1/sqrt(fan_in))
    bound = 1.0 / math.sqrt(d_in)
    kw, kb = jax.random.split(key)
    w = jax.random.uniform(kw, (d_out, d_in), jnp.float32, -bound, bound)
    b = jax.random.uniform(kb, (1, d_out), jnp.float32, -bound, bound)
    return w, b


if __name__ == "__main__":
    B, S, D, H = 2, 8, 32, 4

    root = jax.random.PRNGKey(0)
    keys = jax.random.split(root, 8)

    wq, bq = _init_linear(keys[0], D, D)
    wk, bk = _init_linear(keys[1], D, D)
    wv, bv = _init_linear(keys[2], D, D)
    wo, bo = _init_linear(keys[3], D, D)
    params = dict(wq=wq, bq=bq, wk=wk, bk=bk, wv=wv, bv=bv, wo=wo, bo=bo)

    query = jax.random.normal(keys[4], (B, S, D), jnp.float32)
    key_t = jax.random.normal(keys[5], (B, S, D), jnp.float32)
    value = jax.random.normal(keys[6], (B, S, D), jnp.float32)

    ref = _reference_forward(query, key_t, value, params, n_heads=H)

    # f32 path (parity check: only the approx EUP reciprocal / dropped-but-cancelling
    # K bias differ from the reference).
    out_f32 = alibi_mha_forward(query, key_t, value, params, n_heads=H,
                                compute_dtype=jnp.float32)
    out_f32 = jax.block_until_ready(out_f32)
    assert out_f32.shape == (B, S, D)
    assert jnp.allclose(out_f32, ref, atol=2e-3, rtol=2e-3), "f32 kernel mismatch vs reference"

    # Default bf16-operand / f32-accumulate path (MXU-native on v5e/v6e/v7x).
    out_bf16 = alibi_mha_forward(query, key_t, value, params, n_heads=H)
    out_bf16 = jax.block_until_ready(out_bf16)
    assert out_bf16.shape == (B, S, D)
    assert jnp.allclose(out_bf16, ref, atol=2e-2, rtol=2e-2), "bf16 kernel mismatch vs reference"

    print("KERNEL_OK")
</pallas_src>

<mosaic_0001>
module attributes {stable_mosaic.version = 11 : i64} {
  func.func @_qkv_proj_kernel(%arg0: i32, %arg1: i32, %arg2: i32, %arg3: memref<1x8x32xf32, #tpu.memory_space<vmem>>, %arg4: memref<1x8x32xf32, #tpu.memory_space<vmem>>, %arg5: memref<1x8x32xf32, #tpu.memory_space<vmem>>, %arg6: memref<4x32x8xf32, #tpu.memory_space<vmem>>, %arg7: memref<4x1x8xf32, #tpu.memory_space<vmem>>, %arg8: memref<4x32x8xf32, #tpu.memory_space<vmem>>, %arg9: memref<4x32x8xf32, #tpu.memory_space<vmem>>, %arg10: memref<4x1x8xf32, #tpu.memory_space<vmem>>, %arg11: memref<1x1x8x8xf32, #tpu.memory_space<vmem>>, %arg12: memref<1x1x8x8xf32, #tpu.memory_space<vmem>>, %arg13: memref<1x1x8x8xf32, #tpu.memory_space<vmem>>) attributes {dimension_semantics = [#tpu.dimension_semantics<parallel>, #tpu.dimension_semantics<parallel>, #tpu.dimension_semantics<arbitrary>], iteration_bounds = array<i64: 2, 1, 4>, scalar_prefetch = 0 : i64, scratch_operands = 0 : i64, tpu.core_type = #tpu.core_type<tc>, window_params = [{transform_indices = @transform_0, window_bounds = array<i64: 1, 8, 32>}, {transform_indices = @transform_1, window_bounds = array<i64: 1, 8, 32>}, {transform_indices = @transform_2, window_bounds = array<i64: 1, 8, 32>}, {pipeline_mode = #tpu.pipeline_mode<synchronous>, transform_indices = @transform_3, window_bounds = array<i64: 4, 32, 8>}, {pipeline_mode = #tpu.pipeline_mode<synchronous>, transform_indices = @transform_4, window_bounds = array<i64: 4, 1, 8>}, {pipeline_mode = #tpu.pipeline_mode<synchronous>, transform_indices = @transform_5, window_bounds = array<i64: 4, 32, 8>}, {pipeline_mode = #tpu.pipeline_mode<synchronous>, transform_indices = @transform_6, window_bounds = array<i64: 4, 32, 8>}, {pipeline_mode = #tpu.pipeline_mode<synchronous>, transform_indices = @transform_7, window_bounds = array<i64: 4, 1, 8>}, {transform_indices = @transform_8, window_bounds = array<i64: 1, 1, 8, 8>}, {transform_indices = @transform_9, window_bounds = array<i64: 1, 1, 8, 8>}, {transform_indices = @transform_10, window_bounds = array<i64: 1, 1, 8, 8>}]} {
    %c0 = arith.constant 0 : index
    %c0_0 = arith.constant 0 : index
    %c0_1 = arith.constant 0 : index
    %0 = vector.load %arg3[%c0, %c0_0, %c0_1] : memref<1x8x32xf32, #tpu.memory_space<vmem>>, vector<1x8x32xf32>
    %1 = vector.shape_cast %0 : vector<1x8x32xf32> to vector<8x32xf32>
    %c0_2 = arith.constant 0 : index
    %c0_3 = arith.constant 0 : index
    %c0_4 = arith.constant 0 : index
    %2 = vector.load %arg4[%c0_2, %c0_3, %c0_4] : memref<1x8x32xf32, #tpu.memory_space<vmem>>, vector<1x8x32xf32>
    %3 = vector.shape_cast %2 : vector<1x8x32xf32> to vector<8x32xf32>
    %c0_5 = arith.constant 0 : index
    %c0_6 = arith.constant 0 : index
    %c0_7 = arith.constant 0 : index
    %4 = vector.load %arg5[%c0_5, %c0_6, %c0_7] : memref<1x8x32xf32, #tpu.memory_space<vmem>>, vector<1x8x32xf32>
    %5 = vector.shape_cast %4 : vector<1x8x32xf32> to vector<8x32xf32>
    %6 = arith.index_cast %arg2 : i32 to index
    %c0_8 = arith.constant 0 : index
    %c0_9 = arith.constant 0 : index
    %7 = vector.load %arg6[%6, %c0_8, %c0_9] : memref<4x32x8xf32, #tpu.memory_space<vmem>>, vector<1x32x8xf32>
    %8 = vector.shape_cast %7 : vector<1x32x8xf32> to vector<32x8xf32>
    %cst = arith.constant dense<0.000000e+00> : vector<8x8xf32>
    %9 = tpu.matmul %1, %8, %cst {dimension_numbers = #tpu.dot_dimension_numbers<[1], [0], [0], [1], [0, 0, 1, 1], [], []>} : vector<8x32xf32>, vector<32x8xf32>, vector<8x8xf32> -> vector<8x8xf32>
    %10 = arith.index_cast %arg2 : i32 to index
    %c0_10 = arith.constant 0 : index
    %c0_11 = arith.constant 0 : index
    %11 = vector.load %arg7[%10, %c0_10, %c0_11] : memref<4x1x8xf32, #tpu.memory_space<vmem>>, vector<1x1x8xf32>
    %12 = vector.shape_cast %11 : vector<1x1x8xf32> to vector<1x8xf32>
    %13 = vector.broadcast %12 : vector<1x8xf32> to vector<8x8xf32>
    %14 = arith.addf %9, %13 : vector<8x8xf32>
    %15 = arith.index_cast %arg2 : i32 to index
    %c0_12 = arith.constant 0 : index
    %c0_13 = arith.constant 0 : index
    %16 = vector.load %arg8[%15, %c0_12, %c0_13] : memref<4x32x8xf32, #tpu.memory_space<vmem>>, vector<1x32x8xf32>
    %17 = vector.shape_cast %16 : vector<1x32x8xf32> to vector<32x8xf32>
    %cst_14 = arith.constant dense<0.000000e+00> : vector<8x8xf32>
    %18 = tpu.matmul %3, %17, %cst_14 {dimension_numbers = #tpu.dot_dimension_numbers<[1], [0], [0], [1], [0, 0, 1, 1], [], []>} : vector<8x32xf32>, vector<32x8xf32>, vector<8x8xf32> -> vector<8x8xf32>
    %19 = arith.index_cast %arg2 : i32 to index
    %c0_15 = arith.constant 0 : index
    %c0_16 = arith.constant 0 : index
    %20 = vector.load %arg9[%19, %c0_15, %c0_16] : memref<4x32x8xf32, #tpu.memory_space<vmem>>, vector<1x32x8xf32>
    %21 = vector.shape_cast %20 : vector<1x32x8xf32> to vector<32x8xf32>
    %cst_17 = arith.constant dense<0.000000e+00> : vector<8x8xf32>
    %22 = tpu.matmul %5, %21, %cst_17 {dimension_numbers = #tpu.dot_dimension_numbers<[1], [0], [0], [1], [0, 0, 1, 1], [], []>} : vector<8x32xf32>, vector<32x8xf32>, vector<8x8xf32> -> vector<8x8xf32>
    %23 = arith.index_cast %arg2 : i32 to index
    %c0_18 = arith.constant 0 : index
    %c0_19 = arith.constant 0 : index
    %24 = vector.load %arg10[%23, %c0_18, %c0_19] : memref<4x1x8xf32, #tpu.memory_space<vmem>>, vector<1x1x8xf32>
    %25 = vector.shape_cast %24 : vector<1x1x8xf32> to vector<1x8xf32>
    %26 = vector.broadcast %25 : vector<1x8xf32> to vector<8x8xf32>
    %27 = arith.addf %22, %26 : vector<8x8xf32>
    %cst_20 = arith.constant 0.353553385 : f32
    %28 = vector.broadcast %cst_20 : f32 to vector<8x8xf32>
    %29 = arith.mulf %14, %28 : vector<8x8xf32>
    %c0_21 = arith.constant 0 : index
    %c0_22 = arith.constant 0 : index
    %c0_23 = arith.constant 0 : index
    %c0_24 = arith.constant 0 : index
    %30 = vector.load %arg11[%c0_21, %c0_22, %c0_23, %c0_24] : memref<1x1x8x8xf32, #tpu.memory_space<vmem>>, vector<1x1x8x8xf32>
    %31 = vector.shape_cast %30 : vector<1x1x8x8xf32> to vector<8x8xf32>
    %32 = vector.shape_cast %29 : vector<8x8xf32> to vector<1x1x8x8xf32>
    tpu.vector_store %arg11[%c0_21, %c0_22, %c0_23, %c0_24], %32 {strides = array<i32>} : memref<1x1x8x8xf32, #tpu.memory_space<vmem>>, vector<1x1x8x8xf32>,
    %c0_25 = arith.constant 0 : index
    %c0_26 = arith.constant 0 : index
    %c0_27 = arith.constant 0 : index
    %c0_28 = arith.constant 0 : index
    %33 = vector.load %arg12[%c0_25, %c0_26, %c0_27, %c0_28] : memref<1x1x8x8xf32, #tpu.memory_space<vmem>>, vector<1x1x8x8xf32>
    %34 = vector.shape_cast %33 : vector<1x1x8x8xf32> to vector<8x8xf32>
    %35 = vector.shape_cast %18 : vector<8x8xf32> to vector<1x1x8x8xf32>
    tpu.vector_store %arg12[%c0_25, %c0_26, %c0_27, %c0_28], %35 {strides = array<i32>} : memref<1x1x8x8xf32, #tpu.memory_space<vmem>>, vector<1x1x8x8xf32>,
    %c0_29 = arith.constant 0 : index
    %c0_30 = arith.constant 0 : index
    %c0_31 = arith.constant 0 : index
    %c0_32 = arith.constant 0 : index
    %36 = vector.load %arg13[%c0_29, %c0_30, %c0_31, %c0_32] : memref<1x1x8x8xf32, #tpu.memory_space<vmem>>, vector<1x1x8x8xf32>
    %37 = vector.shape_cast %36 : vector<1x1x8x8xf32> to vector<8x8xf32>
    %38 = vector.shape_cast %27 : vector<8x8xf32> to vector<1x1x8x8xf32>
    tpu.vector_store %arg13[%c0_29, %c0_30, %c0_31, %c0_32], %38 {strides = array<i32>} : memref<1x1x8x8xf32, #tpu.memory_space<vmem>>, vector<1x1x8x8xf32>,
    return
  }
  func.func @transform_0(%arg0: i32, %arg1: i32, %arg2: i32) -> (i32, i32, i32) {
    %c0_i32 = arith.constant 0 : i32
    %c0_i32_0 = arith.constant 0 : i32
    return %arg0, %arg1, %c0_i32 : i32, i32, i32
  }
  func.func @transform_1(%arg0: i32, %arg1: i32, %arg2: i32) -> (i32, i32, i32) {
    %c0_i32 = arith.constant 0 : i32
    %c0_i32_0 = arith.constant 0 : i32
    return %arg0, %arg1, %c0_i32 : i32, i32, i32
  }
  func.func @transform_2(%arg0: i32, %arg1: i32, %arg2: i32) -> (i32, i32, i32) {
    %c0_i32 = arith.constant 0 : i32
    %c0_i32_0 = arith.constant 0 : i32
    return %arg0, %arg1, %c0_i32 : i32, i32, i32
  }
  func.func @transform_3(%arg0: i32, %arg1: i32, %arg2: i32) -> (i32, i32, i32) {
    %c0_i32 = arith.constant 0 : i32
    %c0_i32_0 = arith.constant 0 : i32
    %c0_i32_1 = arith.constant 0 : i32
    %c0_i32_2 = arith.constant 0 : i32
    return %c0_i32, %c0_i32_0, %c0_i32_1 : i32, i32, i32
  }
  func.func @transform_4(%arg0: i32, %arg1: i32, %arg2: i32) -> (i32, i32, i32) {
    %c0_i32 = arith.constant 0 : i32
    %c0_i32_0 = arith.constant 0 : i32
    %c0_i32_1 = arith.constant 0 : i32
    %c0_i32_2 = arith.constant 0 : i32
    return %c0_i32, %c0_i32_0, %c0_i32_1 : i32, i32, i32
  }
  func.func @transform_5(%arg0: i32, %arg1: i32, %arg2: i32) -> (i32, i32, i32) {
    %c0_i32 = arith.constant 0 : i32
    %c0_i32_0 = arith.constant 0 : i32
    %c0_i32_1 = arith.constant 0 : i32
    %c0_i32_2 = arith.constant 0 : i32
    return %c0_i32, %c0_i32_0, %c0_i32_1 : i32, i32, i32
  }
  func.func @transform_6(%arg0: i32, %arg1: i32, %arg2: i32) -> (i32, i32, i32) {
    %c0_i32 = arith.constant 0 : i32
    %c0_i32_0 = arith.constant 0 : i32
    %c0_i32_1 = arith.constant 0 : i32
    %c0_i32_2 = arith.constant 0 : i32
    return %c0_i32, %c0_i32_0, %c0_i32_1 : i32, i32, i32
  }
  func.func @transform_7(%arg0: i32, %arg1: i32, %arg2: i32) -> (i32, i32, i32) {
    %c0_i32 = arith.constant 0 : i32
    %c0_i32_0 = arith.constant 0 : i32
    %c0_i32_1 = arith.constant 0 : i32
    %c0_i32_2 = arith.constant 0 : i32
    return %c0_i32, %c0_i32_0, %c0_i32_1 : i32, i32, i32
  }
  func.func @transform_8(%arg0: i32, %arg1: i32, %arg2: i32) -> (i32, i32, i32, i32) {
    %c0_i32 = arith.constant 0 : i32
    %c0_i32_0 = arith.constant 0 : i32
    return %arg0, %arg2, %arg1, %c0_i32 : i32, i32, i32, i32
  }
  func.func @transform_9(%arg0: i32, %arg1: i32, %arg2: i32) -> (i32, i32, i32, i32) {
    %c0_i32 = arith.constant 0 : i32
    %c0_i32_0 = arith.constant 0 : i32
    return %arg0, %arg2, %arg1, %c0_i32 : i32, i32, i32, i32
  }
  func.func @transform_10(%arg0: i32, %arg1: i32, %arg2: i32) -> (i32, i32, i32, i32) {
    %c0_i32 = arith.constant 0 : i32
    %c0_i32_0 = arith.constant 0 : i32
    return %arg0, %arg2, %arg1, %c0_i32 : i32, i32, i32, i32
  }
}

</mosaic_0001>

<bundles_post_ra>
// kernel: tpu_custom_call.1
= control target key start
LH: loop header
LB: loop body
LE: loop exit
PB: predicated region body
PF: predicated region fallthrough
CT: control target
= control target key end

     0   :  { %s1602_s0 = inlined_call_operand.vmem [shape: f32[2,8,32], index: 0, kind: input, shape index: {}]   ;;  %s1603_s1 = inlined_call_operand.vmem [shape: f32[2,8,32], index: 1, kind: input, shape index: {}]   ;;  %s1604_s2 = inlined_call_operand.vmem [shape: f32[2,8,32], index: 2, kind: input, shape index: {}]   ;;  %s1605_s3 = inlined_call_operand.vmem [shape: f32[4,32,8], index: 3, kind: input, shape index: {}]   ;;  %s1606_s4 = inlined_call_operand.vmem [shape: f32[4,1,8], index: 4, kind: input, shape index: {}]   ;;  %s1607_s5 = inlined_call_operand.vmem [shape: f32[4,32,8], index: 5, kind: input, shape index: {}]   ;;  %s1608_s6 = inlined_call_operand.vmem [shape: f32[4,32,8], index: 6, kind: input, shape index: {}]   ;;  %s1609_s7 = inlined_call_operand.vmem [shape: f32[4,1,8], index: 7, kind: input, shape index: {}]   ;;  %s1610_s8 = inlined_call_operand.hbm [shape: f32[2,4,8,8], index: 8, kind: output, shape index: {0}]   ;;  %s1611_s9 = inlined_call_operand.hbm [shape: f32[2,4,8,8], index: 9, kind: output, shape index: {1}]   ;;  %s1612_s10 = inlined_call_operand.hbm [shape: f32[2,4,8,8], index: 10, kind: output, shape index: {2}]  }
   0x1   :  { %1621 = sst [smem:[#allocation13_spill]] %s1602_s0 }
   0x2   :  { %1622 = sst [smem:[#allocation14_spill]] %s1603_s1 }
   0x3   :  { %1623 = sst [smem:[#allocation15_spill]] %s1604_s2 }
   0x4   :  { %1624 = sst [smem:[#allocation16_spill]] %s1605_s3 }
   0x5   :  { %1625 = sst [smem:[#allocation17_spill]] %s1607_s5 }
   0x6   :  { %16 = vsyncpa [#allocation3], 0 }
   0x7   :  { %18 = vsyncpa [#allocation3 + $0x1], 0 }
   0x8   :  { %19 = vsyncpa [#allocation5], 0 }
   0x9   :  { %21 = vsyncpa [#allocation5 + $0x1], 0  ;;  %s1343_s13 = smov 0   ;;  %s1345_s14 = smov 0  }
   0xa   :  { %s1347_s15 = smov 0   ;;  %s1349_s16 = smov 0  }
   0xb   :  { %s1351_s17 = smov 0   ;;  %s1353_s18 = smov 0  }
   0xc   :  { %s1355_s19 = smov 0   ;;  %s1357_s20 = smov 0  }
   0xd LB: > { %1626 = sst [smem:[#allocation9_spill]] %s1273_s18  ;;  %s1614_s21 = sadd.s32 4294967295, %s1281_s20   ;;  %s1281_s20 = sphi %s1357_s20, %s27_s20   ;;  %s1277_s19 = sphi %s1355_s19, %s1647_s19   ;;  %s1273_s18 = sphi %s1353_s18, %s1646_s18   ;;  %s1269_s17 = sphi %s1351_s17, %s1645_s17   ;;  %s1265_s16 = sphi %s1349_s16, %s1644_s16   ;;  %s1261_s15 = sphi %s1347_s15, %s1650_s15   ;;  %s1257_s14 = sphi %s1345_s14, %s1649_s14   ;;  %s1253_s13 = sphi %s1343_s13, %s1648_s13  }
   0xe   : > { %1627 = sst [smem:[#allocation10_spill]] %s1277_s19  ;;  %s1613_s22 = sadd.s32 4294967294, %s1281_s20  }
   0xf   : > { %s39_s23 = sadd.s32 1, %s1273_s18  ;;  %s46_s24 = sadd.s32 1, %s1277_s19 }
  0x10   : > { %p40_p0 = scmp.ge.s32.totalorder %s39_s23, 4  ;;  %p256_p1 = scmp.ne.s32.totalorder %s1261_s15, %s1257_s14 }
  0x11   : > { %p257_p2 = scmp.eq.s32.totalorder %s1614_s21, 7  ;;  %p262_p5 = scmp.ne.s32.totalorder %s1257_s14, %s1253_s13 }
  0x12   : > { %s1652_s23 = smov (%p40_p0, %s39_s23), 0  ;;  %s1654_s24 = smov (!%p40_p0, %s46_s24), %s1277_s19 }
  0x13   : > { %1628 = sst [smem:[#allocation11_spill]] %s1652_s23  ;;  %s240_s25 = ssub.s32 %s1273_s18, %s1652_s23 }
  0x14   : > { %p1396_p3 = por %p257_p2, %p256_p1  ;;  %p48_p4 = scmp.ge.s32.totalorder %s1654_s24, 2 }
  0x15   : > { %p263_p6 = scmp.eq.s32.totalorder %s1613_s22, 7  ;;  %p978_p7 = scmp.ge.s32.totalorder %s1281_s20, 1 }
  0x16   : > { %s1656_s24 = smov (%p48_p4, %s1654_s24), 0  ;;  %p386_p9 = scmp.lt.s32.totalorder %s1281_s20, 9 }
  0x17   : > { %1630 = sst [smem:[#allocation12_spill]] %s1656_s24  ;;  %p1407_p8 = por %p263_p6, %p262_p5 }
  0x18   : > { %s239_s28 = ssub.s32 %s1277_s19, %s1656_s24  ;;  %s246_s29 = sadd.s32 1, %s1261_s15 }
  0x19   : > { %s241_s30 = sor.u32 %s240_s25, %s239_s28  ;;  %p387_p10 = pnand %p978_p7, %p386_p9 }
  0x1a   : > { %p244_p11 = scmp.eq.s32.totalorder %s241_s30, 0  ;;  %s985_s12 = sshll.u32 (!%p387_p10), %s1265_s16, 5 }
  0x1b   : > { %390 = sbr.rel (%p387_p10) target bundleno = 301 (0x12d), region = 52  ;;  %p450_p12 = scmp.lt.s32.totalorder (!%p387_p10), %s1269_s17, 1 }
  0x1c   : > { %s1416_s11 = scalar_select %p244_p11, %s1261_s15, %s246_s29  }
  0x1d   : > { %s1632_s3 = sld [smem:[#allocation16_spill]] (!%p387_p10)  ;;  %s640_s24 = scalar_lea.vmem (!%p387_p10), %s1608_s6, %s985_s12 }
  0x1e   : > { %s1633_s5 = sld [smem:[#allocation17_spill]] (!%p387_p10)  ;;  %s1619_s19 = sand.u32 (!%p387_p10), 1, %s1257_s14  }
  0x1f   : > { %s1634_s0 = sld [smem:[#allocation13_spill]] (!%p387_p10)  ;;  %s480_s22 = scalar_lea.vmem (!%p387_p10), %s1606_s4, %s1265_s16 }
  0x20   : > { %v1283_v0 = vmov 0.0   ;;  %vm1284_vm0 = vmmov 0   ;;  %s451_s30 = scalar_select %p450_p12, %s1269_s17, 1  ;;  %vm488_vm1 = vcmask 261120   ;;  %v644_v9 = vld [vmem:[%s640_s24 + $0x18] sm:$0xff]  ;;  %v643_v12 = vld [vmem:[%s640_s24 + $0x10] sm:$0xff] }
  0x21   : > { %1017 = vmatprep.subr.mxu0 %v1283_v0  ;;  %1025 = vmatprep.mubr.msk.f32.mxu0 %vm1284_vm0, %v1283_v0  ;;  %s1635_s1 = sld [smem:[#allocation14_spill]]  ;;  %v642_v13 = vld [vmem:[%s640_s24 + $0x8] sm:$0xff]  ;;  %v641_v14 = vld [vmem:[%s640_s24] sm:$0xff]  ;;  %s1637_s25 = sadd.s32 4294967295, %s1281_s20   ;;  %vm727_vm2 = vcmask 64512  }
  0x22   : > { %1028 = vmatprep.subr.mxu1 %v1283_v0  ;;  %1036 = vmatprep.mubr.msk.f32.mxu1 %vm1284_vm0, %v1283_v0  ;;  %s1429_s21 = sshll.u32 %s451_s30, 3  ;;  %s1636_s2 = sld [smem:[#allocation15_spill]]  ;;  %v986_v16 = vld [vmem:[%s480_s22] ss:$0 sm:$0xff] }
  0x23   : > { %s475_s23 = scalar_lea.vmem %s1632_s3, %s985_s12 }
  0x24   : > { %s562_s29 = scalar_lea.vmem %s1633_s5, %s985_s12  ;;  %v479_v1 = vld [vmem:[%s475_s23 + $0x18] sm:$0xff]  ;;  %v478_v2 = vld [vmem:[%s475_s23 + $0x10] sm:$0xff]  ;;  %v477_v5 = vld [vmem:[%s475_s23 + $0x8] sm:$0xff]  ;;  %s1285_s12 = smov [#allocation4]  }
  0x25   : > { %1018 = vmatpush3.msra.mxu0 %v479_v1  ;;  %v566_v3 = vld [vmem:[%s562_s29 + $0x18] sm:$0xff]  ;;  %v565_v4 = vld [vmem:[%s562_s29 + $0x10] sm:$0xff]  ;;  %s456_s28 = scalar_lea.vmem %s1634_s0, %s1429_s21  ;;  %v564_v6 = vld [vmem:[%s562_s29 + $0x8] sm:$0xff] }
  0x26   : > { %1019 = vmatprep.subr.mxu0 %v1283_v0  ;;  %1029 = vmatpush3.msra.mxu1 %v566_v3  ;;  %v476_v7 = vld [vmem:[%s475_s23] sm:$0xff]  ;;  %s994_s23 = sshll.u32 %s1269_s17, 2 }
  0x27   : > { %1020 = vmatpush3.msra.mxu0 %v478_v2  ;;  %1030 = vmatprep.subr.mxu1 %v1283_v0  ;;  %s463_s18 = scalar_lea.vmem %s1635_s1, %s1429_s21  ;;  %v471_v8 = vld [vmem:[%s456_s28] sm:$0xff]  ;;  %s754_s24 = sadd.s32 %s1265_s16, %s994_s23 }
  0x28   : > { %1021 = vmatprep.subr.mxu0 %v1283_v0  ;;  %1031 = vmatpush3.msra.mxu1 %v565_v4  ;;  %v563_v10 = vld [vmem:[%s562_s29] sm:$0xff]  ;;  %s1463_s28 = sand.u32 1, %s1637_s25   ;;  %s1465_s30 = sshll.u32 %s754_s24, 7 }
  0x29   : > { %1022 = vmatpush3.msra.mxu0 %v477_v5  ;;  %1032 = vmatprep.subr.mxu1 %v1283_v0  ;;  %v472_v11 = vld [vmem:[%s463_s18] sm:$0xff]  ;;  %s470_s18 = scalar_lea.vmem %s1636_s2, %s1429_s21  ;;  %s1458_s21 = sshll.u32 %s1619_s19, 3 }
  0x2a   : > { %1023 = vmatprep.subr.mxu0 %v1283_v0  ;;  %1033 = vmatpush3.msra.mxu1 %v564_v6  ;;  %v473_v15 = vld [vmem:[%s470_s18] sm:$0xff]  ;;  %s442_s17 = scalar_lea.vmem [#allocation4], %s1458_s21  ;;  %s1620_s29 = scalar_lea.vmem [#allocation2], %s1458_s21 }
  0x2b   : > { %1024 = vmatpush3.msra.mxu0 %v476_v7  ;;  %1034 = vmatprep.subr.mxu1 %v1283_v0  ;;  %s774_s3 = sshll.u32 %s442_s17, 4  ;;  %s758_s23 = sshll.u32 %s1620_s29, 4  ;;  %s1481_s3 = int_to_ptr.vmem [resolvable:$true] %s774_s3  ;;  %s1490_s23 = int_to_ptr.vmem [resolvable:$true] %s758_s23 }
  0x2c   : > { %1026 = vmatmul.mubr.msk.f32.vlgmr.msra.gmra.mxu0 %vm488_vm1, %v471_v8  ;;  %1039 = vmatprep.subr.mxu0 %v1283_v0  ;;  %s1479_s22 = scalar_lea.hbm %s1611_s9, %s1465_s30  ;;  %s1488_s18 = scalar_lea.hbm %s1610_s8, %s1465_s30 }
  0x2d   : > { %1040 = vmatpush3.msra.mxu0 %v644_v9  ;;  %1035 = vmatpush3.msra.mxu1 %v563_v10  ;;  %s1133_s25 = scalar_lea.vmem %s1481_s3, 128  ;;  %s1137_s29 = sshll.u32 %s1285_s12, 4  ;;  %s1138_s29 = int_to_ptr.vmem [resolvable:$false] %s1137_s29 }
  0x2e   : > { %1041 = vmatprep.subr.mxu0 %v1283_v0  ;;  %1037 = vmatmul.mubr.msk.f32.vlgmr.msra.gmra.mxu1 %vm488_vm1, %v472_v11  ;;  %p1134_p13 = scmp.ne.s32.totalorder %s1481_s3, %s1133_s25  ;;  %s1139_s0 = scalar_lea.vmem %s1138_s29, 256 }
  0x2f   : > { %1042 = vmatpush3.msra.mxu0 %v643_v12  ;;  %1047 = vmatprep.mubr.msk.f32.mxu0 %vm1284_vm0, %v1283_v0  ;;  %p1140_p2 = scmp.lt.s32.totalorder %s1481_s3, %s1138_s29  ;;  %p1141_p4 = scmp.lt.s32.totalorder %s1139_s0, %s1133_s25 }
  0x30   : > { %1043 = vmatprep.subr.mxu0 %v1283_v0  ;;  %p1135_p0 = pnand %p1134_p13, %p1396_p3 }
  0x31   : > { %1044 = vmatpush3.msra.mxu0 %v642_v13  ;;  %p1142_p5 = por %p1141_p4, %p1140_p2 }
  0x32   : > { %1045 = vmatprep.subr.mxu0 %v1283_v0  ;;  %p1136_p1 = pneg %p1135_p0 }
  0x33   : > { %1046 = vmatpush3.msra.mxu0 %v641_v14 }
  0x34   : > { %1048 = vmatmul.mubr.msk.f32.vlgmr.msra.gmra.mxu0 %vm488_vm1, %v473_v15  ;;  %p1143_p6 = pnand %p1142_p5, %p1136_p1 }
  0xec   : > { %v558_v17 = vpop.f32.mrf.mxu0 }
  0xed   : > { %v559_v18 = vadd.f32 %v986_v16, %v558_v17 }
  0xee   : > { %v1027_v19 = vpop.f32.mrf.mxu0  ;;  %v636_v20 = vpop.f32.mrf.mxu1 }
  0xef   : > { %v726_v21 = vmul.f32 0.35355338, %v559_v18  ;;  %729 = vst.msk [vmem:[%s442_s17] sm:$0xff] %vm727_vm2, %v636_v20 }
  0xf0   : > { %v1038_v22 = vpop.f32.mrf.mxu1 }
  0xf1   : > { %1146 = shalt.err (!%p1143_p6)
}
  0xf2   : > { %s1147_s17 = scalar_lea.hbm %s1479_s22, 128  ;;  %s1151_s12 = scalar_lea.hbm %s1611_s9, 1024 }
  0xf3   : > { %p1148_p7 = scmp.ne.s32.totalorder %s1479_s22, %s1147_s17  ;;  %p1152_p11 = scmp.lt.s32.totalorder %s1479_s22, %s1611_s9 }
  0xf4   : > { %p1153_p12 = scmp.lt.s32.totalorder %s1151_s12, %s1147_s17 }
  0xf5   : > { %p1149_p9 = pnand %p1148_p7, %p1396_p3 }
  0xf6   : > { %p1154_p13 = por %p1153_p12, %p1152_p11 }
  0xf7   : > { %p1150_p10 = pneg %p1149_p9 }
  0xf9   : > { %p1155_p0 = pnand %p1154_p13, %p1150_p10 }
  0xfb   : > { %1158 = shalt.err (!%p1155_p0)
}
  0xfc   : > { %s1638_s0 = scalar_lea.sflag [#allocation5], %s1463_s28  ;;  %s1639_s1 = scalar_lea.vmem [#allocation2], %s1458_s21 }
  0xfd   : > { %1051 = dma.vmem_to_hbm [thread:$0]  (%p1396_p3), %s1481_s3, 128, %s1479_s22, %s1638_s0   ;;  %728 = vst.msk [vmem:[%s1639_s1] sm:$0xff] %vm727_vm2, %v726_v21 }
  0xfe   : > { %s449_s29 = scalar_lea.vmem [#allocation6], %s1458_s21  ;;  %s1640_s24 = scalar_lea.vmem %s1609_s7, %s1265_s16 }
  0xff   : > { %s1521_s19 = sshll.u32 %s449_s29, 4  ;;  %v989_v23 = vld [vmem:[%s1640_s24] ss:$0 sm:$0xff]  ;;  %s1641_s5 = sand.u32 1, %s1257_s14   ;;  %s791_s19 = int_to_ptr.vmem [resolvable:$true] %s1521_s19 }
 0x100   : > { %s732_s12 = scalar_lea.sflag [#allocation3], %s1641_s5  ;;  %s1159_s2 = scalar_lea.vmem %s1490_s23, 128 }
 0x101   : > { %p1160_p1 = scmp.ne.s32.totalorder %s1490_s23, %s1159_s2  ;;  %s1286_s3 = smov [#allocation2]  }
 0x102   : > { %s1163_s22 = sshll.u32 %s1286_s3, 4  ;;  %s1164_s22 = int_to_ptr.vmem [resolvable:$false] %s1163_s22 }
 0x103   : > { %p1161_p2 = pnand %p1160_p1, %p1396_p3  ;;  %s1165_s0 = scalar_lea.vmem %s1164_s22, 256 }
 0x104   : > { %p1166_p5 = scmp.lt.s32.totalorder %s1490_s23, %s1164_s22  ;;  %p1167_p6 = scmp.lt.s32.totalorder %s1165_s0, %s1159_s2 }
 0x105   : > { %p1162_p4 = pneg %p1161_p2 }
 0x106   : > { %p1168_p7 = por %p1167_p6, %p1166_p5 }
 0x108   : > { %p1169_p9 = pnand %p1168_p7, %p1162_p4 }
 0x10a   : > { %1172 = shalt.err (!%p1169_p9)
}
 0x10b   : > { %s1173_s16 = scalar_lea.hbm %s1488_s18, 128  ;;  %s1177_s17 = scalar_lea.hbm %s1610_s8, 1024 }
 0x10c   : > { %p1174_p10 = scmp.ne.s32.totalorder %s1488_s18, %s1173_s16  ;;  %p1178_p13 = scmp.lt.s32.totalorder %s1488_s18, %s1610_s8 }
 0x10d   : > { %p1179_p0 = scmp.lt.s32.totalorder %s1177_s17, %s1173_s16 }
 0x10e   : > { %p1175_p11 = pnand %p1174_p10, %p1396_p3 }
 0x10f   : > { %p1180_p1 = por %p1179_p0, %p1178_p13 }
 0x110   : > { %p1176_p12 = pneg %p1175_p11 }
 0x112   : > { %p1181_p2 = pnand %p1180_p1, %p1176_p12 }
 0x114   : > { %1184 = shalt.err (!%p1181_p2)
}
 0x115   : > { %1050 = dma.vmem_to_hbm [thread:$0]  (%p1396_p3), %s1490_s23, 128, %s1488_s18, %s732_s12   ;;  %v722_v24 = vpop.f32.mrf.mxu0 }
 0x116   : > { %v723_v25 = vadd.f32 %v989_v23, %v722_v24  ;;  %s788_s22 = scalar_lea.hbm %s1612_s10, %s1465_s30  ;;  %s1185_s0 = scalar_lea.vmem %s791_s19, 128 }
 0x117   : > { %v1049_v26 = vpop.f32.mrf.mxu0  ;;  %p1186_p4 = scmp.ne.s32.totalorder %s791_s19, %s1185_s0  ;;  %s1287_s16 = smov [#allocation6]  }
 0x118   : > { %730 = vst.msk [vmem:[%s449_s29] sm:$0xff] %vm727_vm2, %v723_v25  ;;  %s1189_s1 = sshll.u32 %s1287_s16, 4  ;;  %s1190_s1 = int_to_ptr.vmem [resolvable:$false] %s1189_s1 }
 0x119   : > { %p1187_p5 = pnand %p1186_p4, %p1396_p3  ;;  %s1191_s23 = scalar_lea.vmem %s1190_s1, 256 }
 0x11a   : > { %p1192_p7 = scmp.lt.s32.totalorder %s791_s19, %s1190_s1  ;;  %p1193_p9 = scmp.lt.s32.totalorder %s1191_s23, %s1185_s0 }
 0x11b   : > { %p1188_p6 = pneg %p1187_p5 }
 0x11c   : > { %p1194_p10 = por %p1193_p9, %p1192_p7 }
 0x11e   : > { %p1195_p11 = pnand %p1194_p10, %p1188_p6 }
 0x120   : > { %1198 = shalt.err (!%p1195_p11)
}
 0x121   : > { %s1199_s30 = scalar_lea.hbm %s788_s22, 128  ;;  %s1203_s29 = scalar_lea.hbm %s1612_s10, 1024 }
 0x122   : > { %p1200_p12 = scmp.ne.s32.totalorder %s788_s22, %s1199_s30  ;;  %p1204_p1 = scmp.lt.s32.totalorder %s788_s22, %s1612_s10 }
 0x123   : > { %p1205_p2 = scmp.lt.s32.totalorder %s1203_s29, %s1199_s30 }
 0x124   : > { %p1201_p13 = pnand %p1200_p12, %p1396_p3 }
 0x125   : > { %p1206_p4 = por %p1205_p2, %p1204_p1 }
 0x126   : > { %p1202_p0 = pneg %p1201_p13 }
 0x128   : > { %p1207_p5 = pnand %p1206_p4, %p1202_p0 }
 0x12a   : > { %1210 = shalt.err (!%p1207_p5)
}
 0x12b   : > { %s1642_s17 = scalar_lea.sflag [#allocation5], %s1463_s28 }
 0x12c   : > { %1052 = dma.vmem_to_hbm [thread:$0]  (%p1396_p3), %s791_s19, 128, %s788_s22, %s1642_s17  }
 0x12d PF: > { %p1066_p6 = scmp.ge.s32.totalorder %s1281_s20, 2  ;;  %s802_s24 = sand.u32 1, %s1253_s13  }
 0x12e   : > { %s803_s5 = scalar_lea.sflag [#allocation3], %s802_s24 }
 0x12f   : > { %p1057_p7 = pnand %p1066_p6, %p1407_p8 }
 0x131   : > { %p1058_p9 = pneg %p1057_p7 }
 0x133   : > { %1244 = dma.done.wait (%p1058_p9), %s803_s5, 128  }
 0x134   : > { %1246 = vsyncadd (%p1058_p9), %s803_s5, 4294967168  ;;  %s1643_s2 = sadd.s32 4294967294, %s1281_s20  }
 0x135   : > { %s811_s3 = sand.u32 1, %s1643_s2  }
 0x136   : > { %s812_s0 = scalar_lea.sflag [#allocation5], %s811_s3 }
 0x137   : > { %1248 = dma.done.wait (%p1058_p9), %s812_s0, 256  }
 0x138   : > { %1250 = vsyncadd (%p1058_p9), %s812_s0, 4294967040  ;;  %s27_s20 = sadd.s32 1, %s1281_s20   ;;  %s1644_s16 = sld [smem:[#allocation9_spill]] }
 0x139   : > { %p24_p3 = scmp.ge.s32.totalorder %s27_s20, 10   ;;  %s1645_s17 = sld [smem:[#allocation10_spill]] }
 0x13a   : > { %s1646_s18 = sld [smem:[#allocation11_spill]]  ;;  %s1648_s13 = smov %s1257_s14 }
 0x13b   : > { %s1647_s19 = sld [smem:[#allocation12_spill]]  ;;  %s1649_s14 = smov %s1261_s15 }
 0x13c   : > { %s1650_s15 = smov %s1416_s11  ;;  %26 = sbr.rel (!%p24_p3) target bundleno = 13 (0xd), region = 130 }
 0x141   :  { %826 = vsyncpa [#allocation3], 1 }
 0x142   :  { %828 = vsyncpa [#allocation3 + $0x1], 1 }
 0x143   :  { %829 = vsyncpa [#allocation5], 1 }
 0x144   :  { %831 = vsyncpa [#allocation5 + $0x1], 1 }

</bundles_post_ra>
